<compile_context>
chip_gen: v5e
topology: v5e:2x2
jax: 0.10.0
libtpu: 0.0.40
codegen_flags: <defaults>
</compile_context>

<pallas_src>
import functools

import numpy as np
import jax
import jax.numpy as jnp
from jax.experimental import pallas as pl
from jax.experimental.pallas import tpu as pltpu


def _round_up(v, m):
    return ((v + m - 1) // m) * m


def _ceil_div(a, b):
    return -(-a // b)


def _freq_bands(num_freqs, log_sampling):
    """Static frequency bands (module constants) baked into the kernel."""
    if num_freqs <= 0:
        return ()
    max_freq = num_freqs - 1
    if log_sampling:
        bands = 2.0 ** np.linspace(0.0, max_freq, num_freqs)
    else:
        bands = np.linspace(2.0 ** 0.0, 2.0 ** max_freq, num_freqs)
    return tuple(float(f) for f in bands)


# Exact sin/cos every _REANCHOR_EVERY bands; at most 3 double-angle steps
# between anchors keeps the recurrence error ~1e-6 (well under 1e-5).
_REANCHOR_EVERY = 4


def _pe_kernel(x_ref, o_ref, *, freqs, include_input, use_recurrence):
    """One lane-tile of the positional encoding (transposed layout).

    x_ref : (d, TN)        coordinates (features on sublanes, rows on lanes)
    o_ref : (out_dim, TN)  embedding, part-major along the sublane axis
    """
    x = x_ref[...].astype(jnp.float32)          # (d, TN), fully lane-dense

    parts = []
    if include_input:
        parts.append(x)

    s = None
    c = None
    for b, f in enumerate(freqs):
        if (not use_recurrence) or (b % _REANCHOR_EVERY == 0):
            xf = x * jnp.float32(f)             # anchor band: exact sin/cos (EUP)
            s = jnp.sin(xf)
            c = jnp.cos(xf)
        else:
            # Double-angle recurrence on the VPU: sin(2a)=2sc, cos(2a)=1-2s^2.
            s, c = 2.0 * s * c, 1.0 - 2.0 * s * s
        # periodic_fns = (sin, cos), in that order, matching the torch module.
        parts.append(s)
        parts.append(c)

    # Assemble the whole tile in registers, then one full-tile store.
    tile = parts[0] if len(parts) == 1 else jnp.concatenate(parts, axis=0)
    o_ref[...] = tile.astype(o_ref.dtype)


def pe_forward_transposed(
    x,
    *,
    num_freqs: int = 4,
    include_input: bool = True,
    log_sampling: bool = True,
    lane_tile: int = 32768,
    out_dtype=jnp.float32,
    vmem_limit_bytes=None,
):
    """Fast path: returns the embedding as (out_dim, N) straight from the kernel.

    N = prod(x.shape[:-1]).  Column j of the result is the embedding of the
    j-th flattened input row; a consumer matmul can take it as a transposed
    operand for free.
    """
    orig_shape = x.shape
    d = int(orig_shape[-1])
    n = int(np.prod(orig_shape[:-1])) if len(orig_shape) > 1 else 1

    freqs = _freq_bands(num_freqs, log_sampling)
    out_dim = d * (int(include_input) + 2 * len(freqs))
    if out_dim == 0:
        raise ValueError(
            "PE with include_input=False and num_freqs=0 produces no outputs.")

    # Recurrence is only exact when consecutive bands differ by exactly 2x.
    use_recurrence = (
        log_sampling
        and len(freqs) >= 2
        and all(abs(freqs[i + 1] - 2.0 * freqs[i]) <= 1e-12 * freqs[i + 1]
                for i in range(len(freqs) - 1))
    )

    # Rows onto lanes: (N, d) -> (d, N).  (See TODO about folding this in-kernel.)
    xt = x.reshape(n, d).astype(jnp.float32).T

    # Lane tile: multiple of 128, large enough to amortize per-step overhead,
    # small enough to fit scoped VMEM, and (for large N) keeping >= ~4 grid
    # steps so v7x's two TensorCores both get work.
    lane_tile = max(128, (int(lane_tile) // 128) * 128)
    if n <= 128:
        tn = n                                   # single full-extent block
    else:
        tn = min(lane_tile, max(128, _round_up(_ceil_div(n, 4), 128)))
    grid = (_ceil_div(n, tn),)

    # Rough double-buffered VMEM footprint; only raise the limit if we exceed
    # the smallest (v5e) scoped-VMEM default.
    itemsize = jnp.dtype(out_dtype).itemsize
    footprint = 2 * (_round_up(d, 8) * tn * 4 + _round_up(out_dim, 8) * tn * itemsize)
    if vmem_limit_bytes is None and footprint > 12 * 1024 * 1024:
        vmem_limit_bytes = footprint + 4 * 1024 * 1024

    # Advisory cost estimate for XLA's scheduler.
    n_anchor_bands = (sum(1 for b in range(len(freqs)) if b % _REANCHOR_EVERY == 0)
                      if use_recurrence else len(freqs))
    cost = pl.CostEstimate(
        flops=int(n * d * (1 + 6 * len(freqs))),
        transcendentals=int(2 * n * d * n_anchor_bands),
        bytes_accessed=int(n * d * 4 + n * out_dim * itemsize),
    )

    kernel = functools.partial(
        _pe_kernel, freqs=freqs, include_input=include_input,
        use_recurrence=use_recurrence)

    out_t = pl.pallas_call(
        kernel,
        out_shape=jax.ShapeDtypeStruct((out_dim, n), out_dtype),
        grid_spec=pltpu.PrefetchScalarGridSpec(
            num_scalar_prefetch=0,
            grid=grid,
            in_specs=[pl.BlockSpec((d, tn), lambda i: (0, i))],
            out_specs=pl.BlockSpec((out_dim, tn), lambda i: (0, i)),
        ),
        compiler_params=pltpu.CompilerParams(
            dimension_semantics=("parallel",),
            vmem_limit_bytes=vmem_limit_bytes),
        cost_estimate=cost,
    )(xt)
    return out_t


def pe_forward(
    x,
    *,
    num_freqs: int = 4,
    include_input: bool = True,
    log_sampling: bool = True,
    lane_tile: int = 32768,
    out_dtype=jnp.float32,
    vmem_limit_bytes=None,
):
    """Layout-preserving wrapper matching PE.forward: (..., d) -> (..., out_dim)."""
    out_t = pe_forward_transposed(
        x, num_freqs=num_freqs, include_input=include_input,
        log_sampling=log_sampling, lane_tile=lane_tile, out_dtype=out_dtype,
        vmem_limit_bytes=vmem_limit_bytes)
    out_dim = out_t.shape[0]
    # This final transpose is the only extra HBM pass; fuse it into the
    # consumer (use pe_forward_transposed) whenever possible.
    out = out_t.T
    return out.reshape(*x.shape[:-1], out_dim)


def pe_reference(x, *, num_freqs=4, include_input=True, log_sampling=True):
    """Pure-JAX reference matching the PyTorch module."""
    freq_bands = _freq_bands(num_freqs, log_sampling)
    parts = []
    if include_input:
        parts.append(x)
    for f in freq_bands:
        parts.append(jnp.sin(x * f))
        parts.append(jnp.cos(x * f))
    return jnp.concatenate(parts, axis=-1)


if __name__ == "__main__":
    key = jax.random.PRNGKey(0)
    # cfg: input_dims=3, num_freqs=4, periodic_fns=[sin, cos],
    #      log_sampling=True, include_input=True  ->  out_dim = 3*(1+8) = 27
    batch, seq, input_dims = 2, 128, 3
    num_freqs = 4
    out_dim = input_dims * (1 + 2 * num_freqs)

    k1, k2, k3 = jax.random.split(key, 3)
    x = jax.random.normal(k1, (batch, seq, input_dims), dtype=jnp.float32)

    # Default path: exact torch-module semantics, (..., out_dim).
    out = jax.block_until_ready(pe_forward(x, num_freqs=num_freqs))
    ref = pe_reference(x, num_freqs=num_freqs)
    assert out.shape == (batch, seq, out_dim), out.shape
    assert jnp.allclose(out, ref, atol=1e-5, rtol=1e-5), "mismatch vs reference"

    # Fast path: (out_dim, N) layout, no wrapper output transpose.
    out_t = jax.block_until_ready(pe_forward_transposed(x, num_freqs=num_freqs))
    ref_t = ref.reshape(batch * seq, out_dim).T
    assert out_t.shape == (out_dim, batch * seq), out_t.shape
    assert jnp.allclose(out_t, ref_t, atol=1e-5, rtol=1e-5), "transposed mismatch"

    # Ragged rows: N not a multiple of the lane tile -> masked final block.
    x2 = jax.random.normal(k2, (1000, input_dims), dtype=jnp.float32)
    out2 = jax.block_until_ready(pe_forward(x2, num_freqs=num_freqs, lane_tile=256))
    ref2 = pe_reference(x2, num_freqs=num_freqs)
    assert out2.shape == (1000, out_dim), out2.shape
    assert jnp.allclose(out2, ref2, atol=1e-5, rtol=1e-5), "ragged mismatch"

    # Tiny N (< 128): the block covers the full array extent.
    x3 = jax.random.normal(k3, (100, input_dims), dtype=jnp.float32)
    out3 = jax.block_until_ready(pe_forward(x3, num_freqs=num_freqs))
    ref3 = pe_reference(x3, num_freqs=num_freqs)
    assert out3.shape == (100, out_dim), out3.shape
    assert jnp.allclose(out3, ref3, atol=1e-5, rtol=1e-5), "tiny-N mismatch"

    # bfloat16 output on the fast path (layout-safe with the single full-tile store).
    out_bf = jax.block_until_ready(
        pe_forward_transposed(x, num_freqs=num_freqs, out_dtype=jnp.bfloat16))
    assert out_bf.dtype == jnp.bfloat16
    assert jnp.allclose(out_bf.astype(jnp.float32), ref_t, atol=3e-2, rtol=2e-2), \
        "bf16 mismatch"

    print("KERNEL_OK")
</pallas_src>

<mosaic_0001>
module attributes {stable_mosaic.version = 11 : i64} {
  func.func @_pe_kernel(%arg0: i32, %arg1: memref<3x128xf32, #tpu.memory_space<vmem>>, %arg2: memref<27x128xf32, #tpu.memory_space<vmem>>) attributes {dimension_semantics = [#tpu.dimension_semantics<parallel>], iteration_bounds = array<i64: 2>, scalar_prefetch = 0 : i64, scratch_operands = 0 : i64, tpu.core_type = #tpu.core_type<tc>, window_params = [{transform_indices = @transform_0, window_bounds = array<i64: 3, 128>}, {transform_indices = @transform_1, window_bounds = array<i64: 27, 128>}]} {
    %c0 = arith.constant 0 : index
    %c0_0 = arith.constant 0 : index
    %0 = vector.load %arg1[%c0, %c0_0] : memref<3x128xf32, #tpu.memory_space<vmem>>, vector<3x128xf32>
    %cst = arith.constant 1.000000e+00 : f32
    %1 = vector.broadcast %cst : f32 to vector<3x128xf32>
    %2 = arith.mulf %0, %1 : vector<3x128xf32>
    %3 = math.sin %2 : vector<3x128xf32>
    %4 = math.cos %2 : vector<3x128xf32>
    %cst_1 = arith.constant 2.000000e+00 : f32
    %5 = vector.broadcast %cst_1 : f32 to vector<3x128xf32>
    %6 = arith.mulf %5, %3 : vector<3x128xf32>
    %7 = arith.mulf %6, %4 : vector<3x128xf32>
    %cst_2 = arith.constant 2.000000e+00 : f32
    %8 = vector.broadcast %cst_2 : f32 to vector<3x128xf32>
    %9 = arith.mulf %8, %3 : vector<3x128xf32>
    %10 = arith.mulf %9, %3 : vector<3x128xf32>
    %cst_3 = arith.constant 1.000000e+00 : f32
    %11 = vector.broadcast %cst_3 : f32 to vector<3x128xf32>
    %12 = arith.subf %11, %10 : vector<3x128xf32>
    %cst_4 = arith.constant 2.000000e+00 : f32
    %13 = vector.broadcast %cst_4 : f32 to vector<3x128xf32>
    %14 = arith.mulf %13, %7 : vector<3x128xf32>
    %15 = arith.mulf %14, %12 : vector<3x128xf32>
    %cst_5 = arith.constant 2.000000e+00 : f32
    %16 = vector.broadcast %cst_5 : f32 to vector<3x128xf32>
    %17 = arith.mulf %16, %7 : vector<3x128xf32>
    %18 = arith.mulf %17, %7 : vector<3x128xf32>
    %cst_6 = arith.constant 1.000000e+00 : f32
    %19 = vector.broadcast %cst_6 : f32 to vector<3x128xf32>
    %20 = arith.subf %19, %18 : vector<3x128xf32>
    %cst_7 = arith.constant 2.000000e+00 : f32
    %21 = vector.broadcast %cst_7 : f32 to vector<3x128xf32>
    %22 = arith.mulf %21, %15 : vector<3x128xf32>
    %23 = arith.mulf %22, %20 : vector<3x128xf32>
    %cst_8 = arith.constant 2.000000e+00 : f32
    %24 = vector.broadcast %cst_8 : f32 to vector<3x128xf32>
    %25 = arith.mulf %24, %15 : vector<3x128xf32>
    %26 = arith.mulf %25, %15 : vector<3x128xf32>
    %cst_9 = arith.constant 1.000000e+00 : f32
    %27 = vector.broadcast %cst_9 : f32 to vector<3x128xf32>
    %28 = arith.subf %27, %26 : vector<3x128xf32>
    %29 = tpu.concatenate %0, %3, %4, %7, %12, %15, %20, %23, %28 in 0 : vector<3x128xf32>, vector<3x128xf32>, vector<3x128xf32>, vector<3x128xf32>, vector<3x128xf32>, vector<3x128xf32>, vector<3x128xf32>, vector<3x128xf32>, vector<3x128xf32> -> vector<27x128xf32>
    %c0_10 = arith.constant 0 : index
    %c0_11 = arith.constant 0 : index
    %30 = vector.load %arg2[%c0_10, %c0_11] : memref<27x128xf32, #tpu.memory_space<vmem>>, vector<27x128xf32>
    tpu.vector_store %arg2[%c0_10, %c0_11], %29 {strides = array<i32>} : memref<27x128xf32, #tpu.memory_space<vmem>>, vector<27x128xf32>,
    return
  }
  func.func @transform_0(%arg0: i32) -> (i32, i32) {
    %c0_i32 = arith.constant 0 : i32
    %c0_i32_0 = arith.constant 0 : i32
    return %c0_i32, %arg0 : i32, i32
  }
  func.func @transform_1(%arg0: i32) -> (i32, i32) {
    %c0_i32 = arith.constant 0 : i32
    %c0_i32_0 = arith.constant 0 : i32
    return %c0_i32, %arg0 : i32, i32
  }
}

</mosaic_0001>

<bundles_post_ra>
// kernel: tpu_custom_call.1
= control target key start
LH: loop header
LB: loop body
LE: loop exit
PB: predicated region body
PF: predicated region fallthrough
CT: control target
= control target key end

     0   :  { %6 = vsyncpa [#allocation3], 0  ;;  %s960_s0 = inlined_call_operand.hbm [shape: f32[3,256], index: 0, kind: input, shape index: {}]   ;;  %s961_s1 = inlined_call_operand.hbm [shape: f32[27,256], index: 1, kind: output, shape index: {}]  }
   0x1   :  { %8 = vsyncpa [#allocation3 + $0x1], 0 }
   0x2   :  { %9 = vsyncpa [#allocation4], 0 }
   0x3   :  { %11 = vsyncpa [#allocation4 + $0x1], 0  ;;  %s775_s6 = smov 0   ;;  %s777_s7 = smov 0  }
   0x4   :  { %s779_s8 = smov 0   ;;  %s781_s9 = smov 0  }
   0x5 LB: > { %s796_s10 = sadd.s32 4294967295, %s753_s9   ;;  %s583_s11 = sadd.s32 4294967294, %s753_s9   ;;  %s753_s9 = sphi %s781_s9, %s971_s9   ;;  %s749_s8 = sphi %s779_s8, %s970_s8   ;;  %s745_s7 = sphi %s777_s7, %s969_s7   ;;  %s741_s6 = sphi %s775_s6, %s968_s6  }
   0x6   : > { %s800_s12 = sadd.s32 1, %s753_s9   ;;  %s24_s13 = sadd.s32 1, %s749_s8 }
   0x7   : > { %s21_s14 = ssub.s32 %s753_s9, %s800_s12  ;;  %p31_p0 = scmp.ne.s32.totalorder %s749_s8, %s745_s7 }
   0x8   : > { %p22_p1 = scmp.eq.s32.totalorder %s21_s14, 0  ;;  %p32_p2 = scmp.eq.s32.totalorder %s753_s9, 0 }
   0x9   : > { %p37_p3 = scmp.ne.s32.totalorder %s745_s7, %s741_s6  ;;  %p38_p4 = scmp.eq.s32.totalorder %s796_s10, 0 }
   0xa   : > { %s812_s15 = scalar_select %p22_p1, %s749_s8, %s24_s13  }
   0xb   : > { %p814_p5 = por %p32_p2, %p31_p0  ;;  %p818_p6 = por %p38_p4, %p37_p3 }
   0xc   : > { %p61_p7 = scmp.eq.s32.totalorder %s796_s10, 1  ;;  %p67_p8 = scmp.eq.s32.totalorder %s583_s11, 1 }
   0xd   : > { %p613_p10 = scmp.lt.s32.totalorder %s753_s9, 2  ;;  %s87_s20 = sand.u32 1, %s749_s8  }
   0xe   : > { %p825_p11 = por %p61_p7, %p31_p0  ;;  %p829_p12 = por %p67_p8, %p37_p3 }
   0xf   : > { %s587_s21 = sshll.u32 %s753_s9, 2  ;;  %s586_s22 = sshll.u32 %s87_s20, 2 }
  0x10   : > { %s95_s25 = scalar_lea.hbm %s960_s0, %s587_s21  ;;  %s91_s27 = scalar_lea.vmem [#allocation2], %s586_s22 }
  0x11   : > { %s97_s26 = sshll.u32 %s95_s25, 4  ;;  %s99_s28 = sshll.u32 %s91_s27, 4  ;;  %s98_s26 = int_to_ptr.hbm [resolvable:$true] %s97_s26  ;;  %s100_s28 = int_to_ptr.vmem [resolvable:$true] %s99_s28 }
  0x12   : > { %p840_p13 = pnand %p613_p10, %p814_p5  ;;  %p588_p0 = scmp.ge.s32.totalorder %s753_s9, 1 }
  0x13   : > { %p104_p1 = scmp.lt.s32.totalorder %s753_s9, 3  ;;  %s88_s30 = scalar_lea.sflag [#allocation3], %s87_s20 }
  0x14   : > { %s657_s2 = sshra.s32 %s98_s26, 4  ;;  %p661_p3 = pneg %p840_p13  ;;  %s658_s2 = int_to_ptr.hbm [resolvable:$true] %s657_s2 }
  0x15   : > { %s659_s3 = scalar_lea.hbm %s658_s2, 4  ;;  %s664_s11 = scalar_lea.hbm %s960_s0, 8 }
  0x16   : > { %p660_p2 = scmp.ne.s32.totalorder %s658_s2, %s659_s3  ;;  %p665_p5 = scmp.lt.s32.totalorder %s658_s2, %s960_s0 }
  0x17   : > { %p666_p8 = scmp.lt.s32.totalorder %s664_s11, %s659_s3 }
  0x18   : > { %p662_p4 = pnand %p661_p3, %p660_p2 }
  0x19   : > { %p667_p10 = por %p666_p8, %p665_p5 }
  0x1a   : > { %p663_p7 = pneg %p662_p4 }
  0x1c   : > { %p668_p9 = pnand %p667_p10, %p663_p7 }
  0x1e   : > { %671 = shalt.err (!%p668_p9)
}
  0x1f   : > { %608 = dma.hbm_to_vmem [thread:$0]  (!%p840_p13), %s98_s26, 64, %s100_s28, %s88_s30  }
  0x20   : > { %p105_p2 = pnand %p588_p0, %p104_p1 }
  0x21   : > { %s861_s16 = sand.u32 (!%p105_p2), 1, %s745_s7  }
  0x22   : > { %108 = sbr.rel (%p105_p2) target bundleno = 157 (0x9d), region = 24  ;;  %s589_s20 = sshll.u32 (!%p105_p2), %s861_s16, 2 }
  0x23   : > { %s111_s21 = scalar_lea.sflag (!%p105_p2), [#allocation3], %s861_s16  ;;  %s114_s22 = scalar_lea.vmem (!%p105_p2), [#allocation2], %s589_s20 }
  0x27   : > { %732 = dma.done.wait (%p818_p6), %s111_s21, 64  }
  0x28   : > { %734 = vsyncadd (%p818_p6), %s111_s21, 4294967232  ;;  %v869_v0 = vld [vmem:[%s114_s22] sm:$0x7]  ;;  %v755_v12 = vmov 683565275   ;;  %s590_s17 = sshll.u32 %s861_s16, 5 }
  0x29   : > { %v138_v1 = vand.u32 2139095040, %v869_v0  ;;  %v135_v3 = vand.u32 2147483647, %v869_v0  ;;  %v756_v14 = vmov 2475754826   ;;  %vm137_vm12 = vcmp.lt.s32.totalorder %v869_v0, 0 }
  0x2a   : > { %v757_v16 = vmov 2131351028   ;;  %v758_v18 = vmov 2102212464   ;;  %v759_v20 = vmov 920167782  }
  0x2b   : > { %v139_v2 = vshrl.u32 %v138_v1, 23  ;;  %v142_v6 = vand.u32 8388607, %v135_v3  ;;  %v760_v26 = vmov 1326507024   ;;  %v761_v1 = vmov 0  }
  0x2c   : > { %vm136_vm13 = vcmp.le.f32.partialorder %v135_v3, 0.7853982  ;;  %s598_s23 = sshll.u32 %s796_s10, 3  ;;  %s918_s24 = scalar_lea.vmem [#allocation5], %s590_s17 }
  0x2d   : > { %v591_v4 = vadd.s32 4294967169, %v139_v2  ;;  %v143_v9 = vor.u32 8388608, %v142_v6  ;;  %s506_s27 = scalar_lea.hbm %s961_s1, %s598_s23  ;;  %s507_s10 = sshll.u32 %s918_s24, 4  ;;  %s925_s10 = int_to_ptr.vmem [resolvable:$true] %s507_s10 }
  0x2e   : > { %s509_s28 = sshll.u32 %s506_s27, 4  ;;  %s496_s29 = scalar_lea.sflag [#allocation4], %s861_s16  ;;  %s510_s28 = int_to_ptr.hbm [resolvable:$true] %s509_s28 }
  0x2f   : > { %v145_v5 = vadd.s32 1, %v591_v4  ;;  %v878_v28 = vshll.u32 %v143_v9, 8  ;;  %s701_s30 = sshra.s32 %s510_s28, 4  ;;  %s707_s5 = scalar_lea.hbm %s961_s1, 64  ;;  %s702_s30 = int_to_ptr.hbm [resolvable:$true] %s701_s30 }
  0x30   : > { %s703_s2 = scalar_lea.hbm %s702_s30, 32  ;;  %p708_p0 = scmp.lt.s32.totalorder %s702_s30, %s961_s1 }
  0x31   : > { %vm146_vm0 = vcmp.gt.s32.totalorder %v145_v5, 0  ;;  %v184_v40 = vand.u32 65535, %v878_v28  ;;  %v185_v41 = vshrl.u32 %v878_v28, 16  ;;  %p704_p6 = scmp.ne.s32.totalorder %s702_s30, %s703_s2  ;;  %p709_p1 = scmp.lt.s32.totalorder %s707_s5, %s703_s2 }
  0x32   : > { %v147_v7 = vsel %vm146_vm0, %v145_v5, 0 }
  0x33   : > { %v149_v8 = vand.u32 31, %v147_v7  ;;  %v875_v10 = vshrl.u32 %v147_v7, 5  ;;  %p705_p9 = pnand %p704_p6, %p825_p11  ;;  %p710_p3 = por %p709_p1, %p708_p0 }
  0x35   : > { %v150_v11 = vsub.s32 32, %v149_v8  ;;  %v152_v13 = vshll.u32 %v755_v12, %v149_v8  ;;  %v155_v15 = vshll.u32 %v756_v14, %v149_v8  ;;  %v158_v17 = vshll.u32 %v757_v16, %v149_v8  ;;  %p706_p13 = pneg %p705_p9 }
  0x36   : > { %v161_v19 = vshll.u32 %v758_v18, %v149_v8  ;;  %v164_v21 = vshll.u32 %v759_v20, %v149_v8  ;;  %vm167_vm1 = vcmp.lt.s32.totalorder %v875_v10, 1  ;;  %vm170_vm2 = vcmp.lt.s32.totalorder %v875_v10, 4 }
  0x37   : > { %v153_v22 = vshrl.u32 %v756_v14, %v150_v11  ;;  %v156_v23 = vshrl.u32 %v757_v16, %v150_v11  ;;  %v159_v24 = vshrl.u32 %v758_v18, %v150_v11  ;;  %v162_v25 = vshrl.u32 %v759_v20, %v150_v11  ;;  %p711_p4 = pnand %p710_p3, %p706_p13 }
  0x38   : > { %v165_v27 = vshrl.u32 %v760_v26, %v150_v11  ;;  %vm169_vm3 = vcmp.lt.s32.totalorder %v875_v10, 3  ;;  %vm168_vm4 = vcmp.lt.s32.totalorder %v875_v10, 2  ;;  %v151_v48 = vshrl.u32 %v755_v12, %v150_v11 }
  0x39   : > { %v154_v29 = vor.u32 %v153_v22, %v152_v13  ;;  %v157_v30 = vor.u32 %v156_v23, %v155_v15  ;;  %v160_v31 = vor.u32 %v159_v24, %v158_v17  ;;  %v163_v32 = vor.u32 %v162_v25, %v161_v19 }
  0x3a   : > { %v166_v33 = vor.u32 %v165_v27, %v164_v21 }
  0x3b   : > { %v175_v34 = vsel %vm167_vm1, %v154_v29, %v157_v30  ;;  %v179_v35 = vsel %vm167_vm1, %v157_v30, %v160_v31  ;;  %v176_v36 = vsel %vm170_vm2, %v163_v32, 920167782  ;;  %v171_v61 = vsel %vm167_vm1, %v151_v48, %v154_v29 }
  0x3c   : > { %v180_v37 = vsel %vm170_vm2, %v166_v33, 1326507024  ;;  %v177_v38 = vsel %vm169_vm3, %v160_v31, %v176_v36  ;;  %v172_v63 = vsel %vm170_vm2, %v160_v31, 2102212464 }
  0x3d   : > { %v181_v39 = vsel %vm169_vm3, %v163_v32, %v180_v37  ;;  %v178_v42 = vsel %vm168_vm4, %v175_v34, %v177_v38  ;;  %v173_v12 = vsel %vm169_vm3, %v157_v30, %v172_v63 }
  0x3e   : > { %v182_v43 = vsel %vm168_vm4, %v179_v35, %v181_v39  ;;  %v208_v46 = vand.u32 65535, %v178_v42  ;;  %v209_v47 = vshrl.u32 %v178_v42, 16  ;;  %v174_v20 = vsel %vm168_vm4, %v171_v61, %v173_v12 }
  0x3f   : > { %v186_v44 = vand.u32 65535, %v182_v43  ;;  %v187_v45 = vshrl.u32 %v182_v43, 16  ;;  %v228_v24 = vmul.u32 %v878_v28, %v174_v20  ;;  %vm278_vm4 = vweird.f32 %v869_v0 }
  0x40   : > { %v210_v52 = vmul.u32 %v208_v46, %v184_v40  ;;  %v211_v53 = vmul.u32 %v209_v47, %v184_v40  ;;  %v212_v54 = vmul.u32 %v208_v46, %v185_v41  ;;  %v213_v58 = vmul.u32 %v209_v47, %v185_v41 }
  0x41   : > { %v188_v49 = vmul.u32 %v186_v44, %v184_v40  ;;  %v189_v50 = vmul.u32 %v187_v45, %v184_v40  ;;  %v190_v51 = vmul.u32 %v186_v44, %v185_v41  ;;  %v191_v55 = vmul.u32 %v187_v45, %v185_v41 }
  0x42   : > { %v214_v59 = vshll.u32 %v211_v53, 16  ;;  %v216_v60 = vshll.u32 %v212_v54, 16  ;;  %v215_v9 = vshrl.u32 %v211_v53, 16  ;;  %v217_v16 = vshrl.u32 %v212_v54, 16 }
  0x43   : > { %v192_v56 = vshll.u32 %v189_v50, 16  ;;  %v194_v57 = vshll.u32 %v190_v51, 16  ;;  %v193_v5 = vshrl.u32 %v189_v50, 16  ;;  %v195_v13 = vshrl.u32 %v190_v51, 16 }
  0x44   : > { %vm218_vm6 = vc.u32 %v210_v52, %v214_v59  ;;  %v220_v4 = vadd.s32 %v214_v59, %v210_v52 }
  0x45   : > { %vm196_vm5 = vc.u32 %v188_v49, %v192_v56  ;;  %v198_v62 = vadd.s32 %v192_v56, %v188_v49  ;;  %v219_v7 = vsel %vm218_vm6, 1, %v761_v1  ;;  %vm479_vm6 = vcmask 1045504  }
  0x46   : > { %v197_v2 = vsel %vm196_vm5, 1, %v761_v1  ;;  %v221_v11 = vadd.s32 %v219_v7, %v213_v58  ;;  %vm222_vm8 = vc.u32 %v220_v4, %v216_v60  ;;  %v224_v19 = vadd.s32 %v220_v4, %v216_v60 }
  0x47   : > { %v199_v6 = vadd.s32 %v197_v2, %v191_v55  ;;  %vm200_vm7 = vc.u32 %v198_v62, %v194_v57  ;;  %v223_v15 = vsel %vm222_vm8, 1, %v761_v1  ;;  %vm477_vm5 = vcmask 1042432  }
  0x48   : > { %v201_v8 = vsel %vm200_vm7, 1, %v761_v1  ;;  %v225_v17 = vadd.s32 %v223_v15, %v221_v11  ;;  %vm481_vm7 = vcmask 1040384   ;;  %vm483_vm8 = vcmask 1043456  }
  0x49   : > { %v203_v14 = vadd.s32 %v201_v8, %v199_v6 }
  0x4a   : > { %v226_v21 = vadd.s32 %v225_v17, %v215_v9 }
  0x4b   : > { %v204_v18 = vadd.s32 %v203_v14, %v193_v5 }
  0x4c   : > { %v227_v23 = vadd.s32 %v226_v21, %v217_v16 }
  0x4d   : > { %v205_v22 = vadd.s32 %v204_v18, %v195_v13 }
  0x4e   : > { %v231_v25 = vadd.s32 1, %v227_v23 }
  0x4f   : > { %vm230_vm9 = vc.u32 %v205_v22, %v224_v19  ;;  %v229_v10 = vadd.s32 %v224_v19, %v205_v22 }
  0x50   : > { %v232_v26 = vsel %vm230_vm9, %v231_v25, %v227_v23  ;;  %vm485_vm9 = vcmask 1046528  }
  0x51   : > { %v233_v27 = vadd.s32 %v232_v26, %v228_v24 }
  0x53   : > { %v234_v29 = vadd.s32 536870912, %v233_v27 }
  0x55   : > { %v235_v30 = vshrl.u32 %v234_v29, 30 }
  0x57   : > { %v236_v31 = vshll.u32 %v235_v30, 30  ;;  %v259_v48 = vsub.s32 4, %v235_v30 }
  0x59   : > { %v237_v32 = vsub.s32 %v233_v27, %v236_v31  ;;  %v260_v51 = vsel %vm137_vm12, %v259_v48, %v235_v30 }
  0x5a   : > { %v262_v54 = vsel %vm136_vm13, 0, %v260_v51 }
  0x5b   : > { %vm238_vm10 = vcmp.lt.s32.totalorder %v237_v32, 0  ;;  %v239_v33 = vsub.s32 0, %v237_v32  ;;  %v279_v59 = vadd.s32 3, %v262_v54  ;;  %v434_v2 = vand.u32 3, %v262_v54 }
  0x5d   : > { %v240_v34 = vsel %vm238_vm10, %v239_v33, %v237_v32  ;;  %v280_v1 = vand.u32 3, %v279_v59  ;;  %vm439_vm15 = vcmp.eq.s32.totalorder %v434_v2, 2  ;;  %vm436_vm2 = vcmp.eq.s32.totalorder %v434_v2, 0 }
  0x5e   : > { %v241_v35 = vclz %v240_v34  ;;  %vm435_vm3 = vcmp.lt.s32.totalorder %v434_v2, 2  ;;  %vm487_vm10 = vcmask 1041408  }
  0x5f   : > { %vm285_vm14 = vcmp.eq.s32.totalorder %v280_v1, 2  ;;  %vm281_vm0 = vcmp.lt.s32.totalorder %v280_v1, 2  ;;  %vm282_vm1 = vcmp.eq.s32.totalorder %v280_v1, 0 }
  0x60   : > { %v592_v36 = vadd.s32 4294967294, %v241_v35 }
  0x62   : > { %vm593_vm11 = vcmp.lt.s32.totalorder %v592_v36, 0 }
  0x63   : > { %v244_v37 = vsel %vm593_vm11, 0, %v592_v36  ;;  %vm489_vm11 = vcmask 1044480  }
  0x64   : > { %v245_v38 = vsub.s32 32, %v244_v37  ;;  %v246_v39 = vshll.u32 %v237_v32, %v244_v37  ;;  %v249_v40 = vsub.s32 4294967266, %v244_v37 }
  0x66   : > { %v247_v28 = vshrl.u32 %v229_v10, %v245_v38  ;;  %v250_v41 = vadd.s32 127, %v249_v40 }
  0x68   : > { %v248_v42 = vor.u32 %v247_v28, %v246_v39  ;;  %v251_v43 = vshll.u32 %v250_v41, 23 }
  0x6a   : > { %v252_v44 = vor.u32 4788187, %v251_v43  ;;  %v255_v45 = vcvt.s32.f32 %v248_v42 }
  0x6c   : > { %v253_v46 = vand.u32 2147483647, %v252_v44 }
  0x6e   : > { %v256_v47 = vmul.f32 %v255_v45, %v253_v46 }
  0x70   : > { %v257_v49 = vxor.u32 2147483648, %v256_v47 }
  0x72   : > { %v258_v50 = vsel %vm137_vm12, %v257_v49, %v256_v47 }
  0x73   : > { %v261_v52 = vsel %vm136_vm13, %v869_v0, %v258_v50 }
  0x74   : > { %v263_v53 = vmul.f32 %v261_v52, %v261_v52 }
  0x76   : > { %v264_v55 = vmul.f32 -0.001358992, %v263_v53  ;;  %v271_v56 = vmul.f32 -0.00019511016, %v263_v53 }
  0x78   : > { %v265_v57 = vadd.f32 0.041655596, %v264_v55  ;;  %v272_v58 = vadd.f32 0.008332121, %v271_v56 }
  0x7a   : > { %v266_v60 = vmul.f32 %v265_v57, %v263_v53  ;;  %v273_v61 = vmul.f32 %v272_v58, %v263_v53 }
  0x7c   : > { %v267_v62 = vadd.f32 -0.4999988, %v266_v60  ;;  %v274_v63 = vadd.f32 -0.16666654, %v273_v61 }
  0x7e   : > { %v268_v4 = vmul.f32 %v267_v62, %v263_v53  ;;  %v275_v3 = vmul.f32 %v274_v63, %v263_v53 }
  0x80   : > { %v269_v5 = vadd.f32 1.0, %v268_v4  ;;  %v276_v6 = vadd.f32 1.0, %v275_v3 }
  0x82   : > { %v277_v7 = vmul.f32 %v276_v6, %v261_v52  ;;  %v286_v8 = vxor.u32 2147483648, %v269_v5 }
  0x84   : > { %v283_v9 = vxor.u32 2147483648, %v277_v7  ;;  %v287_v11 = vsel %vm285_vm14, %v286_v8, %v277_v7  ;;  %v441_v12 = vsel %vm439_vm15, %v286_v8, %v277_v7 }
  0x86   : > { %v284_v13 = vsel %vm282_vm1, %v269_v5, %v283_v9  ;;  %v438_v14 = vsel %vm436_vm2, %v269_v5, %v283_v9 }
  0x87   : > { %v288_v15 = vsel %vm281_vm0, %v284_v13, %v287_v11  ;;  %v442_v16 = vsel %vm435_vm3, %v438_v14, %v441_v12 }
  0x88   : > { %v289_v17 = vsel %vm278_vm4, nan, %v288_v15  ;;  %v443_v18 = vsel %vm278_vm4, nan, %v442_v16 }
  0x89   : > { %v444_v19 = vmul.f32 2.0, %v289_v17  ;;  %v457_v20 = vrot.slane %v289_v17, 5  ;;  %v460_v21 = vrot.slane %v443_v18, 2 }
  0x8b   : > { %v445_v22 = vmul.f32 %v444_v19, %v443_v18  ;;  %v478_v23 = vsel %vm477_vm5, %v869_v0, %v457_v20  ;;  %v446_v24 = vmul.f32 %v444_v19, %v289_v17 }
  0x8c   : > { %v480_v25 = vsel %vm479_vm6, %v478_v23, %v460_v21 }
  0x8d   : > { %491 = vst [vmem:[%s918_s24] sm:$0xff] %v480_v25  ;;  %v447_v26 = vsub.f32 1.0, %v446_v24  ;;  %v448_v27 = vmul.f32 2.0, %v445_v22  ;;  %v463_v29 = vrot.slane %v445_v22, 7 }
  0x8f   : > { %v449_v30 = vmul.f32 %v448_v27, %v447_v26  ;;  %v466_v31 = vrot.slane %v447_v26, 4  ;;  %v482_v32 = vsel %vm481_vm7, %v460_v21, %v463_v29  ;;  %v450_v33 = vmul.f32 %v448_v27, %v445_v22 }
  0x91   : > { %v469_v0 = vrot.slane %v449_v30, 1  ;;  %v484_v34 = vsel %vm483_vm8, %v482_v32, %v466_v31  ;;  %v451_v35 = vsub.f32 1.0, %v450_v33  ;;  %v452_v36 = vmul.f32 2.0, %v449_v30 }
  0x93   : > { %v486_v10 = vsel %vm485_vm9, %v484_v34, %v469_v0  ;;  %v453_v37 = vmul.f32 %v452_v36, %v451_v35  ;;  %v472_v38 = vrot.slane %v451_v35, 6  ;;  %v454_v39 = vmul.f32 %v452_v36, %v449_v30 }
  0x94   : > { %492 = vst [vmem:[%s918_s24 + $0x8] sm:$0xff] %v486_v10 }
  0x95   : > { %v475_v40 = vrot.slane %v453_v37, 3  ;;  %v488_v28 = vsel %vm487_vm10, %v469_v0, %v472_v38  ;;  %v455_v41 = vsub.f32 1.0, %v454_v39 }
  0x97   : > { %v490_v42 = vsel %vm489_vm11, %v488_v28, %v475_v40  ;;  %494 = vst [vmem:[%s918_s24 + $0x18] sm:$0x7] %v455_v41 }
  0x98   : > { %493 = vst [vmem:[%s918_s24 + $0x10] sm:$0xff] %v490_v42 }
  0x99   : > { %714 = shalt.err (!%p711_p4)
}
  0x9a   : > { %s762_s14 = smov 128   ;;  %s763_s16 = smov 256  }
  0x9b   : > { %s764_s20 = smov 8  }
  0x9c   : > { %603 = dma.vmem_to_hbm [thread:$0]  (%p825_p11), %s925_s10, 512, %s510_s28, %s496_s29, %s762_s14, %s763_s16, %s764_s20  }
  0x9d PF: > { %s524_s21 = sand.u32 1, %s741_s6   ;;  %p967_p7 = scmp.ge.s32.totalorder %s753_s9, 2 }
  0x9e   : > { %s525_s22 = scalar_lea.sflag [#allocation4], %s524_s21 }
  0x9f   : > { %p610_p5 = pnand %p967_p7, %p829_p12 }
  0xa1   : > { %p611_p8 = pneg %p610_p5 }
  0xa3   : > { %736 = dma.done.wait (%p611_p8), %s525_s22, 512  }
  0xa4   : > { %738 = vsyncadd (%p611_p8), %s525_s22, 4294966784  ;;  %p14_p10 = scmp.ge.s32.totalorder %s800_s12, 4   ;;  %s968_s6 = smov %s745_s7 }
  0xa5   : > { %s969_s7 = smov %s749_s8  ;;  %s970_s8 = smov %s812_s15 }
  0xa6   : > { %s971_s9 = smov %s800_s12  ;;  %16 = sbr.rel (!%p14_p10) target bundleno = 5 (0x5), region = 69 }
  0xab   :  { %531 = vsyncpa [#allocation3], 1 }
  0xac   :  { %533 = vsyncpa [#allocation3 + $0x1], 1 }
  0xad   :  { %534 = vsyncpa [#allocation4], 1 }
  0xae   :  { %536 = vsyncpa [#allocation4 + $0x1], 1 }

</bundles_post_ra>
